<compile_context>
chip_gen: v7x
topology: tpu7x:2x2x1
jax: 0.10.0
libtpu: 0.0.40
codegen_flags: <defaults>
</compile_context>

<pallas_src>
import jax
import jax.numpy as jnp
from jax.experimental import pallas as pl
from jax.experimental.pallas import tpu as pltpu


_LANE = 128            # f32 vreg lane width
_SUBLANE = 8           # f32 vreg sublane count
_MAX_BATCH_TILE = 2048  # keeps VMEM well under v5e's 16 MiB default scope
_SPLIT_THRESHOLD = 1024  # above this, force >=2 grid steps (v7x dual-TC)


def _round_up(n, m):
    return ((n + m - 1) // m) * m


def make_mlp_kernel(num_layers):
    """Fused MLP kernel: num_layers Linear layers, ReLU between all but last."""

    def kernel(*refs):
        x_ref = refs[0]
        out_ref = refs[-1]
        param_refs = refs[1:-1]  # interleaved (w_bf16 (in,out), b_f32 (1,out))

        h = x_ref[...]                                   # (TB, F), f32 or bf16
        for i in range(num_layers):
            w = param_refs[2 * i][...]                   # bf16, VMEM-resident
            b = param_refs[2 * i + 1][...]               # f32
            h = jnp.dot(h.astype(jnp.bfloat16), w,
                        preferred_element_type=jnp.float32) + b
            if i < num_layers - 1:
                h = jnp.maximum(h, 0.0)                  # ReLU (hidden), f32
        out_ref[...] = h.astype(out_ref.dtype)

    return kernel


def _pick_batch_tile(batch):
    """Batch tile: big enough to amortize per-step overhead, >=2 steps for
    large batches (v7x TC sharding), multiple of 8 unless it spans the full
    batch (so the (8,128) block constraint is satisfied either way)."""
    if batch > _MAX_BATCH_TILE:
        return _MAX_BATCH_TILE
    if batch > _SPLIT_THRESHOLD:
        return _round_up(pl.cdiv(batch, 2), _SUBLANE)
    return batch  # single full-extent tile for small/medium batches


def dqn_forward(x, params):
    """x: (B, n_observations) f32 or bf16; params: list of (W_t (in,out) f32,
    b (1,out) f32). Returns raw Q-logits (B, n_actions) in f32."""
    batch, n_obs = x.shape
    num_layers = len(params)
    n_actions = params[-1][0].shape[1]

    # ---- pad hidden widths to lane-dense multiples of 128, cast weights bf16.
    # Head (n_actions) left narrow; no extra MXU-shape padding (HBM-bound). ---
    padded = []
    in_dim = n_obs
    for li, (w, b) in enumerate(params):
        fan_in, fan_out = w.shape
        out_pad = fan_out if li == num_layers - 1 else _round_up(fan_out, _LANE)
        w_p = jnp.zeros((in_dim, out_pad), jnp.float32).at[:fan_in, :fan_out].set(w)
        b_p = jnp.zeros((1, out_pad), jnp.float32).at[:, :fan_out].set(b)
        padded.append((w_p.astype(jnp.bfloat16), b_p))
        in_dim = out_pad

    # ---- batch tiling: no wrapper-side pad copy; partial last block allowed --
    tb = _pick_batch_tile(batch)
    grid = (pl.cdiv(batch, tb),)

    flat = []
    flat_specs = []
    for w_p, b_p in padded:
        flat.extend([w_p, b_p])
        # weights/biases: same (0,0) block every grid step -> VMEM resident
        flat_specs.append(pl.BlockSpec(w_p.shape, lambda i: (0, 0)))
        flat_specs.append(pl.BlockSpec(b_p.shape, lambda i: (0, 0)))

    out_dim = padded[-1][0].shape[1]  # == n_actions (head left narrow)

    flops = 2 * batch * sum(int(w.shape[0]) * int(w.shape[1]) for w, _ in padded)
    bytes_accessed = (
        int(x.size) * x.dtype.itemsize
        + sum(int(w.size) * w.dtype.itemsize + int(b.size) * b.dtype.itemsize
              for w, b in padded)
        + batch * out_dim * 4)

    out = pl.pallas_call(
        make_mlp_kernel(num_layers),
        out_shape=jax.ShapeDtypeStruct((batch, out_dim), jnp.float32),
        grid=grid,
        in_specs=[pl.BlockSpec((tb, n_obs), lambda i: (i, 0))] + flat_specs,
        out_specs=pl.BlockSpec((tb, out_dim), lambda i: (i, 0)),
        compiler_params=pltpu.CompilerParams(
            dimension_semantics=("parallel",)),  # shard batch tiles across TCs
        cost_estimate=pl.CostEstimate(
            flops=flops, transcendentals=0, bytes_accessed=bytes_accessed),
    )(x, *flat)
    return out


def init_dqn_params(key, n_observations, n_actions, hidden_dim):
    """Deterministic init mimicking PyTorch nn.Linear default (uniform +/- 1/sqrt(fan_in))."""
    dims = [n_observations] + list(hidden_dim) + [n_actions]
    params = []
    for i in range(len(dims) - 1):
        fan_in, fan_out = dims[i], dims[i + 1]
        key, kw, kb = jax.random.split(key, 3)
        bound = 1.0 / (fan_in ** 0.5)
        # Stored pre-transposed: (in, out)
        w_t = jax.random.uniform(kw, (fan_in, fan_out), jnp.float32, -bound, bound)
        b = jax.random.uniform(kb, (1, fan_out), jnp.float32, -bound, bound)
        params.append((w_t, b))
    return params


def dqn_reference(x, params):
    """Plain-JAX f32 reference of the same forward pass."""
    h = x
    for w, b in params[:-1]:
        h = jnp.maximum(h @ w + b, 0.0)
    w, b = params[-1]
    return h @ w + b


if __name__ == "__main__":
    # observation_to_values flattens a (5, H, W) board tensor -> n_observations = 5*H*W.
    board_h, board_w = 8, 8
    n_observations = 5 * board_h * board_w  # 320
    n_actions = 4
    hidden_dim = [64, 32]
    batch = 4

    key = jax.random.PRNGKey(0)
    key, kx = jax.random.split(key)
    x = jax.random.uniform(kx, (batch, n_observations), jnp.float32, 0.0, 1.0)

    params = init_dqn_params(key, n_observations, n_actions, hidden_dim)

    out = dqn_forward(x, params)
    out = jax.block_until_ready(out)

    ref = dqn_reference(x, params)
    assert out.shape == (batch, n_actions)
    # Loose tolerance: kernel uses bf16 weights / dot operands (f32 accumulate).
    assert jnp.allclose(out, ref, atol=5e-2, rtol=5e-2), "mismatch vs reference"

    print("KERNEL_OK")
</pallas_src>

<mosaic_0001>
module attributes {stable_mosaic.version = 11 : i64} {
  func.func @kernel(%arg0: i32, %arg1: memref<4x320xf32, #tpu.memory_space<vmem>>, %arg2: memref<320x128xbf16, #tpu.memory_space<vmem>>, %arg3: memref<1x128xf32, #tpu.memory_space<vmem>>, %arg4: memref<128x128xbf16, #tpu.memory_space<vmem>>, %arg5: memref<1x128xf32, #tpu.memory_space<vmem>>, %arg6: memref<128x4xbf16, #tpu.memory_space<vmem>>, %arg7: memref<1x4xf32, #tpu.memory_space<vmem>>, %arg8: memref<4x4xf32, #tpu.memory_space<vmem>>) attributes {dimension_semantics = [#tpu.dimension_semantics<parallel>], iteration_bounds = array<i64: 1>, scalar_prefetch = 0 : i64, scratch_operands = 0 : i64, tpu.core_type = #tpu.core_type<tc>, window_params = [{transform_indices = @transform_0, window_bounds = array<i64: 4, 320>}, {pipeline_mode = #tpu.pipeline_mode<synchronous>, transform_indices = @transform_1, window_bounds = array<i64: 320, 128>}, {pipeline_mode = #tpu.pipeline_mode<synchronous>, transform_indices = @transform_2, window_bounds = array<i64: 1, 128>}, {pipeline_mode = #tpu.pipeline_mode<synchronous>, transform_indices = @transform_3, window_bounds = array<i64: 128, 128>}, {pipeline_mode = #tpu.pipeline_mode<synchronous>, transform_indices = @transform_4, window_bounds = array<i64: 1, 128>}, {pipeline_mode = #tpu.pipeline_mode<synchronous>, transform_indices = @transform_5, window_bounds = array<i64: 128, 4>}, {pipeline_mode = #tpu.pipeline_mode<synchronous>, transform_indices = @transform_6, window_bounds = array<i64: 1, 4>}, {transform_indices = @transform_7, window_bounds = array<i64: 4, 4>}]} {
    %c0 = arith.constant 0 : index
    %c0_0 = arith.constant 0 : index
    %0 = vector.load %arg1[%c0, %c0_0] : memref<4x320xf32, #tpu.memory_space<vmem>>, vector<4x320xf32>
    %c0_1 = arith.constant 0 : index
    %c0_2 = arith.constant 0 : index
    %1 = vector.load %arg2[%c0_1, %c0_2] : memref<320x128xbf16, #tpu.memory_space<vmem>>, vector<320x128xbf16>
    %c0_3 = arith.constant 0 : index
    %c0_4 = arith.constant 0 : index
    %2 = vector.load %arg3[%c0_3, %c0_4] : memref<1x128xf32, #tpu.memory_space<vmem>>, vector<1x128xf32>
    %3 = arith.truncf %0 : vector<4x320xf32> to vector<4x320xbf16>
    %cst = arith.constant dense<0.000000e+00> : vector<4x128xf32>
    %4 = tpu.matmul %3, %1, %cst {dimension_numbers = #tpu.dot_dimension_numbers<[1], [0], [0], [1], [0, 0, 1, 1], [], []>} : vector<4x320xbf16>, vector<320x128xbf16>, vector<4x128xf32> -> vector<4x128xf32>
    %5 = vector.broadcast %2 : vector<1x128xf32> to vector<4x128xf32>
    %6 = arith.addf %4, %5 : vector<4x128xf32>
    %cst_5 = arith.constant 0.000000e+00 : f32
    %7 = vector.broadcast %cst_5 : f32 to vector<4x128xf32>
    %8 = arith.maximumf %6, %7 : vector<4x128xf32>
    %c0_6 = arith.constant 0 : index
    %c0_7 = arith.constant 0 : index
    %9 = vector.load %arg4[%c0_6, %c0_7] : memref<128x128xbf16, #tpu.memory_space<vmem>>, vector<128x128xbf16>
    %c0_8 = arith.constant 0 : index
    %c0_9 = arith.constant 0 : index
    %10 = vector.load %arg5[%c0_8, %c0_9] : memref<1x128xf32, #tpu.memory_space<vmem>>, vector<1x128xf32>
    %11 = arith.truncf %8 : vector<4x128xf32> to vector<4x128xbf16>
    %cst_10 = arith.constant dense<0.000000e+00> : vector<4x128xf32>
    %12 = tpu.matmul %11, %9, %cst_10 {dimension_numbers = #tpu.dot_dimension_numbers<[1], [0], [0], [1], [0, 0, 1, 1], [], []>} : vector<4x128xbf16>, vector<128x128xbf16>, vector<4x128xf32> -> vector<4x128xf32>
    %13 = vector.broadcast %10 : vector<1x128xf32> to vector<4x128xf32>
    %14 = arith.addf %12, %13 : vector<4x128xf32>
    %cst_11 = arith.constant 0.000000e+00 : f32
    %15 = vector.broadcast %cst_11 : f32 to vector<4x128xf32>
    %16 = arith.maximumf %14, %15 : vector<4x128xf32>
    %c0_12 = arith.constant 0 : index
    %c0_13 = arith.constant 0 : index
    %17 = vector.load %arg6[%c0_12, %c0_13] : memref<128x4xbf16, #tpu.memory_space<vmem>>, vector<128x4xbf16>
    %c0_14 = arith.constant 0 : index
    %c0_15 = arith.constant 0 : index
    %18 = vector.load %arg7[%c0_14, %c0_15] : memref<1x4xf32, #tpu.memory_space<vmem>>, vector<1x4xf32>
    %19 = arith.truncf %16 : vector<4x128xf32> to vector<4x128xbf16>
    %cst_16 = arith.constant dense<0.000000e+00> : vector<4x4xf32>
    %20 = tpu.matmul %19, %17, %cst_16 {dimension_numbers = #tpu.dot_dimension_numbers<[1], [0], [0], [1], [0, 0, 1, 1], [], []>} : vector<4x128xbf16>, vector<128x4xbf16>, vector<4x4xf32> -> vector<4x4xf32>
    %21 = vector.broadcast %18 : vector<1x4xf32> to vector<4x4xf32>
    %22 = arith.addf %20, %21 : vector<4x4xf32>
    %c0_17 = arith.constant 0 : index
    %c0_18 = arith.constant 0 : index
    %23 = vector.load %arg8[%c0_17, %c0_18] : memref<4x4xf32, #tpu.memory_space<vmem>>, vector<4x4xf32>
    tpu.vector_store %arg8[%c0_17, %c0_18], %22 {strides = array<i32>} : memref<4x4xf32, #tpu.memory_space<vmem>>, vector<4x4xf32>,
    return
  }
  func.func @transform_0(%arg0: i32) -> (i32, i32) {
    %c0_i32 = arith.constant 0 : i32
    %c0_i32_0 = arith.constant 0 : i32
    return %arg0, %c0_i32 : i32, i32
  }
  func.func @transform_1(%arg0: i32) -> (i32, i32) {
    %c0_i32 = arith.constant 0 : i32
    %c0_i32_0 = arith.constant 0 : i32
    %c0_i32_1 = arith.constant 0 : i32
    return %c0_i32, %c0_i32_0 : i32, i32
  }
  func.func @transform_2(%arg0: i32) -> (i32, i32) {
    %c0_i32 = arith.constant 0 : i32
    %c0_i32_0 = arith.constant 0 : i32
    %c0_i32_1 = arith.constant 0 : i32
    return %c0_i32, %c0_i32_0 : i32, i32
  }
  func.func @transform_3(%arg0: i32) -> (i32, i32) {
    %c0_i32 = arith.constant 0 : i32
    %c0_i32_0 = arith.constant 0 : i32
    %c0_i32_1 = arith.constant 0 : i32
    return %c0_i32, %c0_i32_0 : i32, i32
  }
  func.func @transform_4(%arg0: i32) -> (i32, i32) {
    %c0_i32 = arith.constant 0 : i32
    %c0_i32_0 = arith.constant 0 : i32
    %c0_i32_1 = arith.constant 0 : i32
    return %c0_i32, %c0_i32_0 : i32, i32
  }
  func.func @transform_5(%arg0: i32) -> (i32, i32) {
    %c0_i32 = arith.constant 0 : i32
    %c0_i32_0 = arith.constant 0 : i32
    %c0_i32_1 = arith.constant 0 : i32
    return %c0_i32, %c0_i32_0 : i32, i32
  }
  func.func @transform_6(%arg0: i32) -> (i32, i32) {
    %c0_i32 = arith.constant 0 : i32
    %c0_i32_0 = arith.constant 0 : i32
    %c0_i32_1 = arith.constant 0 : i32
    return %c0_i32, %c0_i32_0 : i32, i32
  }
  func.func @transform_7(%arg0: i32) -> (i32, i32) {
    %c0_i32 = arith.constant 0 : i32
    %c0_i32_0 = arith.constant 0 : i32
    return %arg0, %c0_i32 : i32, i32
  }
}

</mosaic_0001>

<bundles_post_ra>
// kernel: tpu_custom_call.1
= control target key start
LH: loop header
LB: loop body
LE: loop exit
PB: predicated region body
PF: predicated region fallthrough
CT: control target
= control target key end

     0   :  { %12 = vsyncpa [#allocation3], 0  ;;  %s931_s0 = inlined_call_operand.vmem [shape: f32[4,320], index: 0, kind: input, shape index: {}]   ;;  %s932_s1 = inlined_call_operand.hbm [shape: bf16[320,128], index: 1, kind: input, shape index: {}]   ;;  %s933_s2 = inlined_call_operand.vmem [shape: f32[1,128], index: 2, kind: input, shape index: {}]   ;;  %s934_s3 = inlined_call_operand.vmem [shape: bf16[128,128], index: 3, kind: input, shape index: {}]   ;;  %s935_s4 = inlined_call_operand.vmem [shape: f32[1,128], index: 4, kind: input, shape index: {}]   ;;  %s936_s5 = inlined_call_operand.vmem [shape: bf16[128,4], index: 5, kind: input, shape index: {}]   ;;  %s937_s6 = inlined_call_operand.vmem [shape: f32[1,4], index: 6, kind: input, shape index: {}]   ;;  %s938_s7 = inlined_call_operand.hbm [shape: f32[4,4], index: 7, kind: output, shape index: {}]  }
   0x1   :  { %13 = vsyncpa [#allocation4], 0  ;;  %s772_s24 = smov [#allocation2]   ;;  %s724_s28 = scalar_lea.hbm %s932_s1, 2560 }
   0x2   :  { %s21_s25 = sshll.u32 %s772_s24, 4  ;;  %p725_p0 = scmp.ne.s32.totalorder %s932_s1, %s724_s28  ;;  %s22_s25 = int_to_ptr.vmem [resolvable:$true] %s21_s25 }
   0x3   :  { %p728_p1 = scmp.lt.u32.totalorder %s724_s28, %s932_s1 }
   0x5   :  { %p730_p2 = pnand %p728_p1, %p725_p0 }
   0x7   :  { %733 = shalt.err (!%p730_p2)
}
   0x8   :  { %s734_s10 = scalar_lea.vmem %s22_s25, 2560  ;;  %p739_p4 = scmp.lt.s32.totalorder %s22_s25, %s22_s25 }
   0x9   :  { %p735_p3 = scmp.ne.s32.totalorder %s22_s25, %s734_s10  ;;  %p740_p5 = scmp.lt.s32.totalorder %s734_s10, %s734_s10 }
   0xb   :  { %p741_p6 = por %p740_p5, %p739_p4 }
   0xd   :  { %p742_p7 = pnand %p741_p6, %p735_p3 }
   0xf   :  { %745 = shalt.err (!%p742_p7)
}
  0x10   :  { %s773_s11 = smov 64   ;;  %s774_s12 = smov 4  }
  0x11   :  { %27 = dma.hbm_to_vmem [thread:$0]  %s932_s1, 2560, %s22_s25, [#allocation3], %s773_s11, %s773_s11, %s774_s12  }
  0x12   :  { %768 = dma.done.wait [#allocation3], 2560  }
  0x13   :  { %769 = vsyncadd [#allocation3], 4294964736  ;;  %v775_v0 = vmov 0.0   ;;  %vm776_vm0 = vmmov 0   ;;  %v687_v1 = vld [vmem:[#allocation2 + $0x40] sm:$0xff]   ;;  %v689_v3 = vld [vmem:[#allocation2 + $0x48] sm:$0xff]  }
  0x14   :  { %629 = vmatprep.subr.bf16.mxu1 %v775_v0  ;;  %637 = vmatprep.mubr.msk.bf16.mxu1 %vm776_vm0, %v775_v0  ;;  %v688_v2 = vld [vmem:[#allocation2] sm:$0xff]   ;;  %v690_v4 = vld [vmem:[#allocation2 + $0x8] sm:$0xff]   ;;  %v691_v5 = vld [vmem:[#allocation2 + $0x50] sm:$0xff]   ;;  %vm217_vm1 = vcmask 523264   ;;  %s777_s28 = smov [#allocation5]   ;;  %vm527_vm2 = vcmask 27648  }
  0x15   :  { %584 = vmatprep.subr.bf16.mxu0 %v687_v1  ;;  %v692_v6 = vld [vmem:[#allocation2 + $0x10] sm:$0xff]   ;;  %v693_v7 = vld [vmem:[#allocation2 + $0x58] sm:$0xff]   ;;  %v697_v8 = vld [vmem:[#allocation2 + $0x80] sm:$0xff]   ;;  %s535_s29 = sshll.u32 %s777_s28, 4  ;;  %s536_s29 = int_to_ptr.vmem [resolvable:$true] %s535_s29 }
  0x16   :  { %585 = vmatpush3.bf16.msra.mxu0 %v688_v2  ;;  %v694_v9 = vld [vmem:[#allocation2 + $0x18] sm:$0xff]   ;;  %v695_v10 = vld [vmem:[#allocation2 + $0x60] sm:$0xff]   ;;  %630 = vmatpush3.bf16.msra.mxu1 %v697_v8  ;;  %v700_v11 = vld [vmem:[#allocation2 + $0x88] sm:$0xff]   ;;  %p751_p9 = scmp.lt.s32.totalorder %s536_s29, %s536_s29 }
  0x17   :  { %586 = vmatprep.subr.bf16.mxu0 %v689_v3  ;;  %631 = vmatprep.subr.bf16.mxu1 %v775_v0  ;;  %v696_v12 = vld [vmem:[#allocation2 + $0x20] sm:$0xff]   ;;  %v698_v13 = vld [vmem:[#allocation2 + $0x68] sm:$0xff]   ;;  %v703_v14 = vld [vmem:[#allocation2 + $0x90] sm:$0xff]  }
  0x18   :  { %v699_v15 = vld [vmem:[#allocation2 + $0x28] sm:$0xff]   ;;  %v42_v16 = vld [vmem:[%s931_s0] sm:$0xff]  ;;  %v701_v17 = vld [vmem:[#allocation2 + $0x70] sm:$0xff]  }
  0x19   :  { %v86_v18 = vcombine.high %v42_v16, %v42_v16  ;;  %v707_v19 = vld [vmem:[#allocation2 + $0x98] sm:$0xff]   ;;  %v43_v20 = vld [vmem:[%s931_s0 + $0x8] sm:$0xf]  ;;  %v702_v22 = vld [vmem:[#allocation2 + $0x30] sm:$0xff]   ;;  %v88_v28 = vpack.c.bf16 %v42_v16, %v42_v16 }
  0x1a   :  { %587 = vmatpush3.bf16.msra.mxu0 %v690_v4  ;;  %632 = vmatpush3.bf16.msra.mxu1 %v700_v11  ;;  %v704_v23 = vld [vmem:[#allocation2 + $0x78] sm:$0xff]   ;;  %v90_v24 = vpack.c.bf16 %v43_v20, %v43_v20  ;;  %v708_v26 = vld [vmem:[%s934_s3] sm:$0xff]   ;;  %v709_v27 = vld [vmem:[%s934_s3 + $0x8] sm:$0xff]  }
  0x1b   :  { %588 = vmatprep.subr.bf16.mxu0 %v691_v5  ;;  %633 = vmatprep.subr.bf16.mxu1 %v775_v0  ;;  %v89_v21 = vpack.c.bf16 %v86_v18, %v86_v18  ;;  %v705_v25 = vld [vmem:[#allocation2 + $0x38] sm:$0xff]   ;;  %v710_v29 = vld [vmem:[%s934_s3 + $0x10] sm:$0xff]   ;;  %v712_v31 = vld [vmem:[%s934_s3 + $0x20] sm:$0xff]  }
  0x1c   :  { %v711_v30 = vld [vmem:[%s934_s3 + $0x18] sm:$0xff]   ;;  %v713_v32 = vld [vmem:[%s934_s3 + $0x28] sm:$0xff]   ;;  %v714_v33 = vld [vmem:[%s934_s3 + $0x30] sm:$0xff]  }
  0x1d   :  { %253 = vmatprep.mubr.bf16.mxu0 %v89_v21  ;;  %v715_v34 = vld [vmem:[%s934_s3 + $0x38] sm:$0xff]   ;;  %v716_v35 = vld [vmem:[%s936_s5] sm:$0xff]   ;;  %v717_v36 = vld [vmem:[%s936_s5 + $0x8] sm:$0xff]  }
  0x1e   :  { %589 = vmatpush3.bf16.msra.mxu0 %v692_v6  ;;  %634 = vmatpush3.bf16.msra.mxu1 %v703_v14  ;;  %v718_v37 = vld [vmem:[%s936_s5 + $0x10] sm:$0xff]   ;;  %v719_v38 = vld [vmem:[%s936_s5 + $0x18] sm:$0xff]   ;;  %v720_v39 = vld [vmem:[%s936_s5 + $0x20] sm:$0xff]  }
  0x1f   :  { %590 = vmatprep.subr.bf16.mxu0 %v693_v7  ;;  %635 = vmatprep.subr.bf16.mxu1 %v775_v0  ;;  %v721_v40 = vld [vmem:[%s936_s5 + $0x28] sm:$0xff]   ;;  %v544_v47 = vld [vmem:[%s933_s2] ss:$0 sm:$0xff]  ;;  %v722_v55 = vld [vmem:[%s936_s5 + $0x30] sm:$0xff]  }
  0x20   :  { %v723_v56 = vld [vmem:[%s936_s5 + $0x38] sm:$0xff]   ;;  %v566_v57 = vld [vmem:[%s935_s4] ss:$0 sm:$0xff]  ;;  %s746_s4 = scalar_lea.vmem %s536_s29, 64 }
  0x21   :  { %p747_p8 = scmp.ne.s32.totalorder %s536_s29, %s746_s4  ;;  %p752_p10 = scmp.lt.s32.totalorder %s746_s4, %s746_s4 }
  0x22   :  { %591 = vmatpush3.bf16.msra.mxu0 %v694_v9  ;;  %636 = vmatpush3.bf16.msra.mxu1 %v707_v19 }
  0x23   :  { %592 = vmatprep.subr.bf16.mxu0 %v695_v10  ;;  %641 = vmatprep.subr.bf16.mxu1 %v775_v0  ;;  %p753_p11 = por %p752_p10, %p751_p9 }
  0x25   :  { %638 = vmatmul.mubr.msk.bf16.vlgmr.msra.gmra.mrb[0].mxu1 %vm217_vm1, %v90_v24  ;;  %p754_p12 = pnand %p753_p11, %p747_p8 }
  0x26   :  { %593 = vmatpush3.bf16.msra.mxu0 %v696_v12  ;;  %642 = vmatpush3.bf16.msra.mxu1 %v708_v26 }
  0x27   :  { %594 = vmatprep.subr.bf16.mxu0 %v698_v13  ;;  %657 = vmatprep.mubr.msk.bf16.mxu1 %vm776_vm0, %v775_v0 }
  0x28   :  { %643 = vmatprep.subr.bf16.mxu1 %v775_v0 }
  0x2a   :  { %595 = vmatpush3.bf16.msra.mxu0 %v699_v15  ;;  %644 = vmatpush3.bf16.msra.mxu1 %v709_v27 }
  0x2b   :  { %596 = vmatprep.subr.bf16.mxu0 %v701_v17  ;;  %645 = vmatprep.subr.bf16.mxu1 %v775_v0 }
  0x2e   :  { %597 = vmatpush3.bf16.msra.mxu0 %v702_v22  ;;  %646 = vmatpush3.bf16.msra.mxu1 %v710_v29 }
  0x2f   :  { %598 = vmatprep.subr.bf16.mxu0 %v704_v23  ;;  %647 = vmatprep.subr.bf16.mxu1 %v775_v0 }
  0x32   :  { %599 = vmatpush3.bf16.msra.mxu0 %v705_v25  ;;  %648 = vmatpush3.bf16.msra.mxu1 %v711_v30 }
  0x33   :  { %661 = vmatprep.subr.bf16.mxu0 %v775_v0  ;;  %649 = vmatprep.subr.bf16.mxu1 %v775_v0 }
  0x35   :  { %254 = vmatmul.mubr.bf16.vlgmr.msra.gmra.mrb[0].mxu0 %v88_v28 }
  0x36   :  { %677 = vmatprep.mubr.msk.bf16.mxu0 %vm776_vm0, %v775_v0  ;;  %650 = vmatpush3.bf16.msra.mxu1 %v712_v31 }
  0x37   :  { %651 = vmatprep.subr.bf16.mxu1 %v775_v0  ;;  %662 = vmatpush3.bf16.msra.mxu0 %v716_v35 }
  0x38   :  { %663 = vmatprep.subr.bf16.mxu0 %v775_v0 }
  0x3a   :  { %652 = vmatpush3.bf16.msra.mxu1 %v713_v32 }
  0x3b   :  { %653 = vmatprep.subr.bf16.mxu1 %v775_v0  ;;  %664 = vmatpush3.bf16.msra.mxu0 %v717_v36 }
  0x3c   :  { %665 = vmatprep.subr.bf16.mxu0 %v775_v0 }
  0x3e   :  { %654 = vmatpush3.bf16.msra.mxu1 %v714_v33 }
  0x3f   :  { %655 = vmatprep.subr.bf16.mxu1 %v775_v0  ;;  %666 = vmatpush3.bf16.msra.mxu0 %v718_v37 }
  0x40   :  { %667 = vmatprep.subr.bf16.mxu0 %v775_v0 }
  0x42   :  { %656 = vmatpush3.bf16.msra.mxu1 %v715_v34 }
  0x43   :  { %668 = vmatpush3.bf16.msra.mxu0 %v719_v38 }
  0x44   :  { %669 = vmatprep.subr.bf16.mxu0 %v775_v0 }
  0x47   :  { %670 = vmatpush3.bf16.msra.mxu0 %v720_v39 }
  0x48   :  { %671 = vmatprep.subr.bf16.mxu0 %v775_v0 }
  0x4b   :  { %672 = vmatpush3.bf16.msra.mxu0 %v721_v40 }
  0x4c   :  { %673 = vmatprep.subr.bf16.mxu0 %v775_v0 }
  0x4f   :  { %674 = vmatpush3.bf16.msra.mxu0 %v722_v55 }
  0x50   :  { %675 = vmatprep.subr.bf16.mxu0 %v775_v0  ;;  %v575_v0 = vld [vmem:[%s937_s6] ss:$0 sm:$0xff] }
  0x53   :  { %676 = vmatpush3.bf16.msra.mxu0 %v723_v56 }
  0xf8   :  { %v295_v41 = vpop.f32.mrb[0].mxu1 }
  0xf9   :  { %v639_v42 = vpop.f32.mrb[1].mxu1 }
  0xfa   :  { %v298_v43 = vpop.f32.mrb[2].mxu1 }
  0xfb   :  { %v640_v44 = vpop.f32.mrb[3].mxu1 }
 0x108   :  { %v600_v45 = vpop.f32.mrb[0].mxu0 }
 0x109   :  { %v601_v46 = vpop.f32.mrb[1].mxu0 }
 0x10a   :  { %v602_v48 = vadd.f32 %v601_v46, %v600_v45  ;;  %v603_v49 = vpop.f32.mrb[2].mxu0 }
 0x10b   :  { %v604_v50 = vpop.f32.mrb[3].mxu0 }
 0x10c   :  { %v256_v51 = vadd.f32 %v602_v48, %v544_v47 }
 0x10e   :  { %v296_v52 = vadd.f32 %v295_v41, %v256_v51 }
 0x110   :  { %v301_v53 = vmax.f32 %v296_v52, 0.0 }
 0x112   :  { %v319_v54 = vpack.c.bf16 %v301_v53, %v301_v53 }
 0x114   :  { %658 = vmatmul.mubr.bf16.vlgmr.msra.gmra.mrb[4].mxu1 %v319_v54 }
 0x1e7   :  { %v408_v58 = vpop.f32.mrb[4].mxu1 }
 0x1e8   :  { %v409_v59 = vadd.f32 %v566_v57, %v408_v58  ;;  %v659_v60 = vpop.f32.mrb[5].mxu1 }
 0x1e9   :  { %v411_v61 = vpop.f32.mrb[6].mxu1 }
 0x1ea   :  { %v414_v62 = vmax.f32 %v409_v59, 0.0  ;;  %v660_v63 = vpop.f32.mrb[7].mxu1 }
 0x1ec   :  { %v432_v1 = vpack.c.bf16 %v414_v62, %v414_v62 }
 0x1ee   :  { %678 = vmatmul.mubr.bf16.vlgmr.msra.gmra.mrb[4].mxu0 %v432_v1 }
 0x2c1   :  { %v521_v2 = vpop.f32.mrb[4].mxu0 }
 0x2c2   :  { %v522_v3 = vadd.f32 %v575_v0, %v521_v2  ;;  %v679_v4 = vpop.f32.mrb[5].mxu0 }
 0x2c3   :  { %v524_v5 = vpop.f32.mrb[6].mxu0 }
 0x2c4   :  { %v680_v6 = vpop.f32.mrb[7].mxu0  ;;  %528 = vst.msk [vmem:[#allocation5] sm:$0xf] %vm527_vm2, %v522_v3 }
 0x2c5   :  { %757 = shalt.err (!%p754_p12)
}
 0x2c6   :  { %s758_s6 = scalar_lea.hbm %s938_s7, 64 }
 0x2c7   :  { %p759_p13 = scmp.ne.s32.totalorder %s938_s7, %s758_s6  ;;  %p762_p0 = scmp.lt.u32.totalorder %s758_s6, %s938_s7 }
 0x2c9   :  { %p764_p1 = pnand %p762_p0, %p759_p13 }
 0x2cb   :  { %767 = shalt.err (!%p764_p1)
}
 0x2cc   :  { %538 = dma.vmem_to_hbm [thread:$0]  %s536_s29, 64, %s938_s7, [#allocation4]  }
 0x2cd   :  { %770 = dma.done.wait [#allocation4], 64  }
 0x2ce   :  { %771 = vsyncadd [#allocation4], 4294967232 }
 0x2cf   :  { %542 = vsyncpa [#allocation3], 1 }
 0x2d0   :  { %543 = vsyncpa [#allocation4], 1 }

</bundles_post_ra>
